<compile_context>
chip_gen: v5e
topology: v5e:2x2
jax: 0.10.0
libtpu: 0.0.40
codegen_flags: <defaults>
</compile_context>

<pallas_src>
import numpy as np
import jax
import jax.numpy as jnp
from jax.experimental import pallas as pl
from jax.experimental.pallas import tpu as pltpu

NUM_T = 81     # bezier parameter samples: np.linspace(0, 1, 81)
T_PAD = 128    # lane padding of the sample axis


def _round_up(x, m):
    return ((x + m - 1) // m) * m


def _bernstein_basis():
    """(1, 8, T_PAD) f32 Bernstein basis: rows [u^3, 3u^2 t, 3u t^2, t^3, 0,..].

    Padded lanes (k >= NUM_T) use t = 1 exactly -> basis column [0, 0, 0, 1],
    i.e. they duplicate the final curve sample, so no lane mask is needed for
    the min-reduction; combined with endpoint-padded point rows they
    contribute exactly 0 to the loss.
    """
    t = np.concatenate([np.linspace(0.0, 1.0, NUM_T), np.ones(T_PAD - NUM_T)])
    u = 1.0 - t
    basis = np.zeros((1, 8, T_PAD), dtype=np.float64)
    basis[0, 0] = u * u * u
    basis[0, 1] = 3.0 * u * u * t
    basis[0, 2] = 3.0 * u * t * t
    basis[0, 3] = t * t * t
    return jnp.asarray(basis, dtype=jnp.float32)


def _bezier_kernel(basis_ref, ctp_ref, pts_ref, out_ref):
    # basis_ref : VMEM (1, 8, T_PAD)   f32   (resident across the whole grid)
    # ctp_ref   : VMEM (C, 1, 8)       f32   [x0,y0,x1,y1,x2,y2,x3,y3] per curve
    # pts_ref   : VMEM (C, n_pad, 2)   f32   inner points (rows padded w/ endpoint)
    # out_ref   : VMEM (C, 1, 128)     f32   per-curve loss broadcast over lanes
    basis = basis_ref[...]                    # (1, 8, T_PAD)
    ctp = ctp_ref[...]                        # (C, 1, 8)
    pts = pts_ref[...]                        # (C, n_pad, 2)

    b0 = basis[:, 0:1, :]                     # (1, 1, T_PAD)  u^3
    b1 = basis[:, 1:2, :]                     # 3 u^2 t
    b2 = basis[:, 2:3, :]                     # 3 u t^2
    b3 = basis[:, 3:4, :]                     # t^3

    x0 = ctp[:, :, 0:1]; y0 = ctp[:, :, 1:2]  # (C, 1, 1) each
    x1 = ctp[:, :, 2:3]; y1 = ctp[:, :, 3:4]
    x2 = ctp[:, :, 4:5]; y2 = ctp[:, :, 5:6]
    x3 = ctp[:, :, 6:7]; y3 = ctp[:, :, 7:8]

    # Vectorized Bernstein evaluation: (C, 1, T_PAD)
    bx = x0 * b0 + x1 * b1 + x2 * b2 + x3 * b3
    by = y0 * b0 + y1 * b1 + y2 * b2 + y3 * b3

    # Squared distances: curves on the batch dim, points on sublanes,
    # curve samples on lanes.  Kept on the VPU (no MXU) on purpose.
    dx = bx - pts[:, :, 0:1]                  # (C, n_pad, T_PAD)
    dy = by - pts[:, :, 1:2]
    d2 = dx * dx + dy * dy

    # Min over curve samples first, sqrt only on the per-point minima
    # (monotone -> identical result to sqrt-then-min).
    min_d = jnp.sqrt(jnp.min(d2, axis=2, keepdims=True))     # (C, n_pad, 1)

    # Padded point rows sit exactly on the endpoint -> contribute exactly 0,
    # so no row mask is required.
    loss = jnp.sum(min_d, axis=1, keepdims=True)              # (C, 1, 1)
    out_ref[...] = jnp.broadcast_to(loss, out_ref.shape)      # lane-dense store


def _pick_group_size(B, n_pad):
    """Curves processed per grid step.

    Amortizes per-grid-step overhead over many curves while keeping the
    (C, n_pad, 128) f32 distance intermediate modest (comfortable under the
    scoped-VMEM default on all generations, incl. v7x's 64 MiB physical VMEM),
    and keeping >= 2 grid steps when possible so both v7x TensorCores get work.
    """
    # TODO(synk): for very large point counts (n_pad >> 2048) the distance tile
    # should additionally be chunked over point rows inside the kernel.
    c = max(8, min(128, ((2048 // max(n_pad, 1)) // 8) * 8))
    b8 = _round_up(max(B, 1), 8)
    if b8 <= c:
        c = b8 if b8 < 16 else max(8, _round_up(b8 // 2, 8))
    return c


def bezier_forward_pallas_batched(ps_batch, ctps_batch, curves_per_step=None):
    """Batched forward.

    ps_batch:   (B, P, 2) points per curve (first/last rows are the endpoints).
    ctps_batch: (B, 4)    control-point params [x1, y1, x2, y2] per curve.
    Returns:    (B,) loss per curve.
    """
    ps_batch = jnp.asarray(ps_batch, jnp.float32)
    ctps_batch = jnp.asarray(ctps_batch, jnp.float32)
    B, P, _ = ps_batch.shape
    n = P - 2                                   # inner points per curve (static)
    # TODO(synk): P == 2 (no inner points) returns 0.0 here; the PyTorch module
    # would call torch.min over an empty axis (which errors) instead.
    n_pad = max(8, _round_up(max(n, 1), 8))

    C = curves_per_step or _pick_group_size(B, n_pad)
    num_groups = -(-B // C)
    b_pad = num_groups * C

    # Per-curve control-point row [x0, y0, x1, y1, x2, y2, x3, y3], shipped as
    # a VMEM (C, 1, 8) block per grid step.
    ctp = jnp.concatenate(
        [ps_batch[:, 0, :], ctps_batch, ps_batch[:, -1, :]], axis=1
    ).reshape(B, 1, 8)

    # Inner points; pad rows with the endpoint (x3, y3) so padded rows are at
    # exactly distance 0 from the t == 1 sample (no in-kernel row mask).
    inner = ps_batch[:, 1:-1, :]                                   # (B, n, 2)
    if n_pad > n:
        tail = jnp.broadcast_to(ps_batch[:, -1:, :], (B, n_pad - n, 2))
        pts = jnp.concatenate([inner, tail], axis=1)               # (B, n_pad, 2)
    else:
        pts = inner

    # Pad the curve axis with all-zero curves (their loss is 0; sliced away).
    if b_pad > B:
        ctp = jnp.pad(ctp, ((0, b_pad - B), (0, 0), (0, 0)))
        pts = jnp.pad(pts, ((0, b_pad - B), (0, 0), (0, 0)))

    out = pl.pallas_call(
        _bezier_kernel,
        out_shape=jax.ShapeDtypeStruct((b_pad, 1, 128), jnp.float32),
        grid=(num_groups,),
        in_specs=[
            # Grid-invariant basis: constant index_map -> stays resident.
            pl.BlockSpec((1, 8, T_PAD), lambda g: (0, 0, 0)),
            # Per-group control points and points.
            pl.BlockSpec((C, 1, 8), lambda g: (g, 0, 0)),
            pl.BlockSpec((C, n_pad, 2), lambda g: (g, 0, 0)),
        ],
        out_specs=pl.BlockSpec((C, 1, 128), lambda g: (g, 0, 0)),
        compiler_params=pltpu.CompilerParams(
            dimension_semantics=("parallel",)),   # shard groups across TCs (v7x)
    )(_bernstein_basis(), ctp, pts)
    return out[:B, 0, 0]                          # (B,)


def bezier_forward_pallas(ps, ctps):
    """Single-curve forward matching the PyTorch module's forward()."""
    ps = jnp.asarray(ps, jnp.float32)
    ctps = jnp.asarray(ctps, jnp.float32)
    return bezier_forward_pallas_batched(ps[None], ctps[None])[0]


def bezier_forward_ref(ps, ctps):
    """Pure-JAX reference matching the PyTorch forward (in fp32)."""
    ps = jnp.asarray(ps, jnp.float32)
    ctps = jnp.asarray(ctps, jnp.float32)
    x0, y0 = ps[0, 0], ps[0, 1]
    x3, y3 = ps[-1, 0], ps[-1, 1]
    x1, y1, x2, y2 = ctps[0], ctps[1], ctps[2], ctps[3]
    inner = ps[1:-1, :]
    t = jnp.linspace(0.0, 1.0, NUM_T).astype(jnp.float32)
    u = 1.0 - t
    bx = (u * (u * (u * x0 + t * x1) + t * (u * x1 + t * x2))
          + t * (u * (u * x1 + t * x2) + t * (u * x2 + t * x3)))
    by = (u * (u * (u * y0 + t * y1) + t * (u * y1 + t * y2))
          + t * (u * (u * y1 + t * y2) + t * (u * y2 + t * y3)))
    bez = jnp.stack([bx, by], axis=1)                     # (81, 2)
    diffs = bez[None, :, :] - inner[:, None, :]           # (N-2, 81, 2)
    dists = jnp.sqrt(jnp.sum(diffs ** 2, axis=2))         # (N-2, 81)
    return jnp.sum(jnp.min(dists, axis=1))


if __name__ == "__main__":
    key = jax.random.PRNGKey(0)
    k1, k2, k3, k4 = jax.random.split(key, 4)

    # Single curve (matches the module's forward): 10 points, 4 ctrl params.
    P = 10
    ps = jax.random.uniform(k1, (P, 2), jnp.float32, minval=0.0, maxval=10.0)
    ctps = jax.random.uniform(k2, (4,), jnp.float32, minval=0.0, maxval=10.0)

    loss = bezier_forward_pallas(ps, ctps)
    jax.block_until_ready(loss)
    ref = bezier_forward_ref(ps, ctps)
    assert np.allclose(np.asarray(loss), np.asarray(ref), rtol=2e-4, atol=1e-2), (
        float(loss), float(ref))

    # Batched: B curves in a single pallas_call, multiple curves per grid step
    # and >= 2 grid steps (exercises the grouped / padded path).
    B = 20
    ps_b = jax.random.uniform(k3, (B, P, 2), jnp.float32, minval=0.0, maxval=10.0)
    ctps_b = jax.random.uniform(k4, (B, 4), jnp.float32, minval=0.0, maxval=10.0)

    losses = bezier_forward_pallas_batched(ps_b, ctps_b)
    jax.block_until_ready(losses)
    refs = jnp.stack([bezier_forward_ref(ps_b[i], ctps_b[i]) for i in range(B)])
    assert np.allclose(np.asarray(losses), np.asarray(refs), rtol=2e-4, atol=1e-2), (
        np.asarray(losses), np.asarray(refs))

    print("KERNEL_OK")
</pallas_src>

<mosaic_0001>
module attributes {stable_mosaic.version = 11 : i64} {
  func.func @_bezier_kernel(%arg0: i32, %arg1: memref<1x8x128xf32, #tpu.memory_space<vmem>>, %arg2: memref<8x1x8xf32, #tpu.memory_space<vmem>>, %arg3: memref<8x8x2xf32, #tpu.memory_space<vmem>>, %arg4: memref<8x1x128xf32, #tpu.memory_space<vmem>>) attributes {dimension_semantics = [#tpu.dimension_semantics<parallel>], iteration_bounds = array<i64: 1>, scalar_prefetch = 0 : i64, scratch_operands = 0 : i64, tpu.core_type = #tpu.core_type<tc>, window_params = [{pipeline_mode = #tpu.pipeline_mode<synchronous>, transform_indices = @transform_0, window_bounds = array<i64: 1, 8, 128>}, {transform_indices = @transform_1, window_bounds = array<i64: 8, 1, 8>}, {transform_indices = @transform_2, window_bounds = array<i64: 8, 8, 2>}, {transform_indices = @transform_3, window_bounds = array<i64: 8, 1, 128>}]} {
    %c0 = arith.constant 0 : index
    %c0_0 = arith.constant 0 : index
    %c0_1 = arith.constant 0 : index
    %0 = vector.load %arg1[%c0, %c0_0, %c0_1] : memref<1x8x128xf32, #tpu.memory_space<vmem>>, vector<1x8x128xf32>
    %c0_2 = arith.constant 0 : index
    %c0_3 = arith.constant 0 : index
    %c0_4 = arith.constant 0 : index
    %1 = vector.load %arg2[%c0_2, %c0_3, %c0_4] : memref<8x1x8xf32, #tpu.memory_space<vmem>>, vector<8x1x8xf32>
    %c0_5 = arith.constant 0 : index
    %c0_6 = arith.constant 0 : index
    %c0_7 = arith.constant 0 : index
    %2 = vector.load %arg3[%c0_5, %c0_6, %c0_7] : memref<8x8x2xf32, #tpu.memory_space<vmem>>, vector<8x8x2xf32>
    %3 = vector.extract_strided_slice %0 {offsets = [0, 0, 0], sizes = [1, 1, 128], strides = [1, 1, 1]} : vector<1x8x128xf32> to vector<1x1x128xf32>
    %4 = vector.extract_strided_slice %0 {offsets = [0, 1, 0], sizes = [1, 1, 128], strides = [1, 1, 1]} : vector<1x8x128xf32> to vector<1x1x128xf32>
    %5 = vector.extract_strided_slice %0 {offsets = [0, 2, 0], sizes = [1, 1, 128], strides = [1, 1, 1]} : vector<1x8x128xf32> to vector<1x1x128xf32>
    %6 = vector.extract_strided_slice %0 {offsets = [0, 3, 0], sizes = [1, 1, 128], strides = [1, 1, 1]} : vector<1x8x128xf32> to vector<1x1x128xf32>
    %7 = vector.extract_strided_slice %1 {offsets = [0, 0, 0], sizes = [8, 1, 1], strides = [1, 1, 1]} : vector<8x1x8xf32> to vector<8x1x1xf32>
    %8 = vector.extract_strided_slice %1 {offsets = [0, 0, 1], sizes = [8, 1, 1], strides = [1, 1, 1]} : vector<8x1x8xf32> to vector<8x1x1xf32>
    %9 = vector.extract_strided_slice %1 {offsets = [0, 0, 2], sizes = [8, 1, 1], strides = [1, 1, 1]} : vector<8x1x8xf32> to vector<8x1x1xf32>
    %10 = vector.extract_strided_slice %1 {offsets = [0, 0, 3], sizes = [8, 1, 1], strides = [1, 1, 1]} : vector<8x1x8xf32> to vector<8x1x1xf32>
    %11 = vector.extract_strided_slice %1 {offsets = [0, 0, 4], sizes = [8, 1, 1], strides = [1, 1, 1]} : vector<8x1x8xf32> to vector<8x1x1xf32>
    %12 = vector.extract_strided_slice %1 {offsets = [0, 0, 5], sizes = [8, 1, 1], strides = [1, 1, 1]} : vector<8x1x8xf32> to vector<8x1x1xf32>
    %13 = vector.extract_strided_slice %1 {offsets = [0, 0, 6], sizes = [8, 1, 1], strides = [1, 1, 1]} : vector<8x1x8xf32> to vector<8x1x1xf32>
    %14 = vector.extract_strided_slice %1 {offsets = [0, 0, 7], sizes = [8, 1, 1], strides = [1, 1, 1]} : vector<8x1x8xf32> to vector<8x1x1xf32>
    %15 = vector.broadcast %7 : vector<8x1x1xf32> to vector<8x1x128xf32>
    %16 = vector.broadcast %3 : vector<1x1x128xf32> to vector<8x1x128xf32>
    %17 = arith.mulf %15, %16 : vector<8x1x128xf32>
    %18 = vector.broadcast %9 : vector<8x1x1xf32> to vector<8x1x128xf32>
    %19 = vector.broadcast %4 : vector<1x1x128xf32> to vector<8x1x128xf32>
    %20 = arith.mulf %18, %19 : vector<8x1x128xf32>
    %21 = arith.addf %17, %20 : vector<8x1x128xf32>
    %22 = vector.broadcast %11 : vector<8x1x1xf32> to vector<8x1x128xf32>
    %23 = vector.broadcast %5 : vector<1x1x128xf32> to vector<8x1x128xf32>
    %24 = arith.mulf %22, %23 : vector<8x1x128xf32>
    %25 = arith.addf %21, %24 : vector<8x1x128xf32>
    %26 = vector.broadcast %13 : vector<8x1x1xf32> to vector<8x1x128xf32>
    %27 = vector.broadcast %6 : vector<1x1x128xf32> to vector<8x1x128xf32>
    %28 = arith.mulf %26, %27 : vector<8x1x128xf32>
    %29 = arith.addf %25, %28 : vector<8x1x128xf32>
    %30 = vector.broadcast %8 : vector<8x1x1xf32> to vector<8x1x128xf32>
    %31 = vector.broadcast %3 : vector<1x1x128xf32> to vector<8x1x128xf32>
    %32 = arith.mulf %30, %31 : vector<8x1x128xf32>
    %33 = vector.broadcast %10 : vector<8x1x1xf32> to vector<8x1x128xf32>
    %34 = vector.broadcast %4 : vector<1x1x128xf32> to vector<8x1x128xf32>
    %35 = arith.mulf %33, %34 : vector<8x1x128xf32>
    %36 = arith.addf %32, %35 : vector<8x1x128xf32>
    %37 = vector.broadcast %12 : vector<8x1x1xf32> to vector<8x1x128xf32>
    %38 = vector.broadcast %5 : vector<1x1x128xf32> to vector<8x1x128xf32>
    %39 = arith.mulf %37, %38 : vector<8x1x128xf32>
    %40 = arith.addf %36, %39 : vector<8x1x128xf32>
    %41 = vector.broadcast %14 : vector<8x1x1xf32> to vector<8x1x128xf32>
    %42 = vector.broadcast %6 : vector<1x1x128xf32> to vector<8x1x128xf32>
    %43 = arith.mulf %41, %42 : vector<8x1x128xf32>
    %44 = arith.addf %40, %43 : vector<8x1x128xf32>
    %45 = vector.extract_strided_slice %2 {offsets = [0, 0, 0], sizes = [8, 8, 1], strides = [1, 1, 1]} : vector<8x8x2xf32> to vector<8x8x1xf32>
    %46 = vector.broadcast %29 : vector<8x1x128xf32> to vector<8x8x128xf32>
    %47 = vector.broadcast %45 : vector<8x8x1xf32> to vector<8x8x128xf32>
    %48 = arith.subf %46, %47 : vector<8x8x128xf32>
    %49 = vector.extract_strided_slice %2 {offsets = [0, 0, 1], sizes = [8, 8, 1], strides = [1, 1, 1]} : vector<8x8x2xf32> to vector<8x8x1xf32>
    %50 = vector.broadcast %44 : vector<8x1x128xf32> to vector<8x8x128xf32>
    %51 = vector.broadcast %49 : vector<8x8x1xf32> to vector<8x8x128xf32>
    %52 = arith.subf %50, %51 : vector<8x8x128xf32>
    %53 = arith.mulf %48, %48 : vector<8x8x128xf32>
    %54 = arith.mulf %52, %52 : vector<8x8x128xf32>
    %55 = arith.addf %53, %54 : vector<8x8x128xf32>
    %cst = arith.constant dense<0x7F800000> : vector<8x8xf32>
    %56 = vector.multi_reduction <minimumf>, %55, %cst [2] : vector<8x8x128xf32> to vector<8x8xf32>
    %57 = vector.shape_cast %56 : vector<8x8xf32> to vector<8x8x1xf32>
    %58 = math.sqrt %57 : vector<8x8x1xf32>
    %cst_8 = arith.constant dense<0.000000e+00> : vector<8x1xf32>
    %59 = vector.multi_reduction <add>, %58, %cst_8 [1] : vector<8x8x1xf32> to vector<8x1xf32>
    %60 = vector.shape_cast %59 : vector<8x1xf32> to vector<8x1x1xf32>
    %61 = vector.shape_cast %60 : vector<8x1x1xf32> to vector<8x1x1xf32>
    %62 = vector.broadcast %61 : vector<8x1x1xf32> to vector<8x1x128xf32>
    %c0_9 = arith.constant 0 : index
    %c0_10 = arith.constant 0 : index
    %c0_11 = arith.constant 0 : index
    %63 = vector.load %arg4[%c0_9, %c0_10, %c0_11] : memref<8x1x128xf32, #tpu.memory_space<vmem>>, vector<8x1x128xf32>
    tpu.vector_store %arg4[%c0_9, %c0_10, %c0_11], %62 {strides = array<i32>} : memref<8x1x128xf32, #tpu.memory_space<vmem>>, vector<8x1x128xf32>,
    return
  }
  func.func @transform_0(%arg0: i32) -> (i32, i32, i32) {
    %c0_i32 = arith.constant 0 : i32
    %c0_i32_0 = arith.constant 0 : i32
    %c0_i32_1 = arith.constant 0 : i32
    %c0_i32_2 = arith.constant 0 : i32
    return %c0_i32, %c0_i32_0, %c0_i32_1 : i32, i32, i32
  }
  func.func @transform_1(%arg0: i32) -> (i32, i32, i32) {
    %c0_i32 = arith.constant 0 : i32
    %c0_i32_0 = arith.constant 0 : i32
    %c0_i32_1 = arith.constant 0 : i32
    return %arg0, %c0_i32, %c0_i32_0 : i32, i32, i32
  }
  func.func @transform_2(%arg0: i32) -> (i32, i32, i32) {
    %c0_i32 = arith.constant 0 : i32
    %c0_i32_0 = arith.constant 0 : i32
    %c0_i32_1 = arith.constant 0 : i32
    return %arg0, %c0_i32, %c0_i32_0 : i32, i32, i32
  }
  func.func @transform_3(%arg0: i32) -> (i32, i32, i32) {
    %c0_i32 = arith.constant 0 : i32
    %c0_i32_0 = arith.constant 0 : i32
    %c0_i32_1 = arith.constant 0 : i32
    return %arg0, %c0_i32, %c0_i32_0 : i32, i32, i32
  }
}

</mosaic_0001>

<bundles_post_ra>
// kernel: tpu_custom_call.1
= control target key start
LH: loop header
LB: loop body
LE: loop exit
PB: predicated region body
PF: predicated region fallthrough
CT: control target
= control target key end

     0   :  { %v1011_v2 = vmov 2   ;;  %v1012_v3 = vmov 0   ;;  %s1402_s0 = inlined_call_operand.vmem [shape: f32[1,8,128], index: 0, kind: input, shape index: {}]   ;;  %s1403_s1 = inlined_call_operand.vmem [shape: f32[8,1,8], index: 1, kind: input, shape index: {}]   ;;  %s1404_s2 = inlined_call_operand.vmem [shape: f32[8,8,2], index: 2, kind: input, shape index: {}]   ;;  %s1405_s3 = inlined_call_operand.hbm [shape: f32[8,1,128], index: 3, kind: output, shape index: {}]  }
   0x1   :  { %v1045_v0 = vld [vmem:[%s1403_s1 + $0x4] sm:$0x1]  ;;  %v1050_v1 = vld [vmem:[%s1403_s1 + $0x2] sm:$0x1]  ;;  %944 = vset.pattern.permute.xlu0 %v1011_v2  ;;  %942 = vset.pattern.permute.xlu2 %v1012_v3  ;;  %v1056_v4 = vld [vmem:[%s1403_s1 + $0x1] sm:$0x1] }
   0x2   :  { %941 = vset.pattern.permute.xlu1 %v1012_v3  ;;  %58 = vperm.xlu2 %942, %v1045_v0  }
   0x3   :  { %46 = vperm.xlu1 %941, %v1050_v1   ;;  %94 = vperm.xlu0 %944, %v1056_v4  }
   0x4   :  { %8 = vsyncpa [#allocation3], 0  ;;  %v1065_v5 = vld [vmem:[%s1403_s1 + $0x5] sm:$0x1]  ;;  %v1070_v6 = vld [vmem:[%s1403_s1 + $0x3] sm:$0x1] }
   0x5   :  { %v1075_v7 = vld [vmem:[%s1403_s1 + $0x6] sm:$0x1]  ;;  %v1083_v8 = vld [vmem:[%s1403_s1 + $0x7] sm:$0x1]  ;;  %v1088_v9 = vld [vmem:[%s1403_s1] sm:$0x1] }
   0x6   :  { %v1013_v10 = vmov 4   ;;  %v1014_v11 = vmov 6   ;;  %v1015_v12 = vmov 3   ;;  %v1016_v13 = vmov 5   ;;  %v1141_v23 = vld [vmem:[%s1402_s0] sm:$0xff]  ;;  %v1151_v29 = vld [vmem:[%s1404_s2 + $0x8] sm:$0xff] }
   0x7   :  { %v1017_v14 = vmov 7   ;;  %v1018_v16 = vmov 1   ;;  %v30_v40 = vld [vmem:[%s1404_s2 + $0x30] sm:$0xff]  ;;  %s918_s20 = sshll.u32 %s1405_s3, 4  ;;  %s1020_s21 = smov 16   ;;  %s919_s20 = int_to_ptr.hbm [resolvable:$true] %s918_s20 }
   0x8   :  { %s1021_s22 = smov 1  }
   0xa   :  { %64 = vperm.xlu2 %942, %v1065_v5  }
   0xb   :  { %52 = vperm.xlu1 %941, %v1070_v6   ;;  %119 = vperm.xlu0 %944, %v1075_v7  }
  0x12   :  { %943 = vset.pattern.permute.xlu2 %v1011_v2 }
  0x13   :  { %76 = vperm.xlu1 %941, %v1083_v8   ;;  %947 = vset.pattern.permute.xlu0 %v1013_v10 }
  0x14   :  { %174 = vperm.xlu0 %947, %v1056_v4   ;;  %89 = vperm.xlu2 %943, %v1088_v9  }
  0x1b   :  { %945 = vset.pattern.permute.xlu1 %v1011_v2 }
  0x1c   :  { %99 = vperm.xlu1 %945, %v1050_v1   ;;  %199 = vperm.xlu0 %947, %v1075_v7  }
  0x1d   :  { %104 = vperm.xlu2 %943, %v1070_v6  }
  0x24   :  { %109 = vperm.xlu1 %945, %v1045_v0   ;;  %950 = vset.pattern.permute.xlu0 %v1014_v11 }
  0x25   :  { %114 = vperm.xlu2 %943, %v1065_v5   ;;  %254 = vperm.xlu0 %950, %v1056_v4  }
  0x2c   :  { %124 = vperm.xlu1 %945, %v1083_v8  }
  0x2d   :  { %946 = vset.pattern.permute.xlu2 %v1013_v10  ;;  %279 = vperm.xlu0 %950, %v1075_v7  }
  0x2e   :  { %169 = vperm.xlu2 %946, %v1088_v9  }
  0x34   :  { %948 = vset.pattern.permute.xlu1 %v1013_v10 }
  0x35   :  { %179 = vperm.xlu1 %948, %v1050_v1   ;;  %955 = vset.pattern.permute.xlu0 %v1015_v12 }
  0x36   :  { %184 = vperm.xlu2 %946, %v1070_v6   ;;  %382 = vperm.xlu0 %955, %v1056_v4  }
  0x3d   :  { %189 = vperm.xlu1 %948, %v1045_v0  }
  0x3e   :  { %194 = vperm.xlu2 %946, %v1065_v5   ;;  %407 = vperm.xlu0 %955, %v1075_v7  }
  0x45   :  { %204 = vperm.xlu1 %948, %v1083_v8  }
  0x46   :  { %949 = vset.pattern.permute.xlu2 %v1014_v11  ;;  %958 = vset.pattern.permute.xlu0 %v1016_v13 }
  0x47   :  { %249 = vperm.xlu2 %949, %v1088_v9   ;;  %462 = vperm.xlu0 %958, %v1056_v4  }
  0x4d   :  { %951 = vset.pattern.permute.xlu1 %v1014_v11 }
  0x4e   :  { %259 = vperm.xlu1 %951, %v1050_v1  }
  0x4f   :  { %264 = vperm.xlu2 %949, %v1070_v6   ;;  %487 = vperm.xlu0 %958, %v1075_v7  }
  0x56   :  { %269 = vperm.xlu1 %951, %v1045_v0  }
  0x57   :  { %274 = vperm.xlu2 %949, %v1065_v5   ;;  %961 = vset.pattern.permute.xlu0 %v1017_v14 }
  0x58   :  { %542 = vperm.xlu0 %961, %v1056_v4  }
  0x5c   :  { %v1119_v15 = vpop.permute.xlu2 %58 }
  0x5d   :  { %v61_v56 = vperm.slane %v1119_v15, 0 }
  0x5e   :  { %284 = vperm.xlu1 %951, %v1083_v8  }
  0x5f   :  { %952 = vset.pattern.permute.xlu2 %v1018_v16  ;;  %v84_v63 = vmul.f32 %v61_v56, %v1141_v23 }
  0x60   :  { %329 = vperm.xlu2 %952, %v1088_v9   ;;  %567 = vperm.xlu0 %961, %v1075_v7  }
  0x64   :  { %v65_v17 = vpop.permute.xlu2 %64 }
  0x65   :  { %v67_v31 = vperm.slane %v65_v17, 0 }
  0x66   :  { %953 = vset.pattern.permute.xlu1 %v1018_v16 }
  0x67   :  { %339 = vperm.xlu1 %953, %v1050_v1   ;;  %v85_v36 = vmul.f32 %v67_v31, %v1141_v23 }
  0x68   :  { %344 = vperm.xlu2 %952, %v1070_v6   ;;  %963 = vset.pattern.permute.xlu0 %v1012_v3 }
  0x69   :  { %34 = vperm.xlu0 %963, %v1088_v9  }
  0x6e   :  { %v1130_v18 = vpop.permute.xlu2 %89 }
  0x6f   :  { %349 = vperm.xlu1 %953, %v1045_v0  }
  0x70   :  { %354 = vperm.xlu2 %952, %v1065_v5  }
  0x71   :  { %40 = vperm.xlu0 %963, %v1056_v4  }
  0x75   :  { %v47_v19 = vpop.permute.xlu1 %46  ;;  %v1135_v20 = vpop.permute.xlu0 %94 }
  0x76   :  { %v49_v45 = vperm.slane %v47_v19, 0 }
  0x77   :  { %v105_v21 = vpop.permute.xlu2 %104  ;;  %364 = vperm.xlu1 %953, %v1083_v8  }
  0x78   :  { %v107_v22 = vperm.slane %v105_v21, 0  ;;  %954 = vset.pattern.permute.xlu2 %v1015_v12  ;;  %v82_v50 = vmul.f32 %v49_v45, %v1141_v23 }
  0x79   :  { %377 = vperm.xlu2 %954, %v1088_v9   ;;  %70 = vperm.xlu0 %963, %v1075_v7  }
  0x7a   :  { %v131_v24 = vmul.f32 %v107_v22, %v1141_v23 }
  0x7c   :  { %v147_v27 = vrot.slane %v131_v24, 1 }
  0x7d   :  { %v53_v25 = vpop.permute.xlu1 %52  ;;  %v1146_v26 = vpop.permute.xlu0 %119 }
  0x7e   :  { %v55_v28 = vperm.slane %v53_v25, 0 }
  0x7f   :  { %v115_v30 = vpop.permute.xlu2 %114  ;;  %956 = vset.pattern.permute.xlu1 %v1015_v12 }
  0x80   :  { %v83_v32 = vmul.f32 %v55_v28, %v1141_v23  ;;  %v117_v33 = vperm.slane %v115_v30, 0  ;;  %387 = vperm.xlu1 %956, %v1050_v1  }
  0x81   :  { %392 = vperm.xlu2 %954, %v1070_v6   ;;  %631 = vperm.xlu0 %963, %v1151_v29  }
  0x82   :  { %v163_v34 = vadd.f32 %v147_v27, %v83_v32  ;;  %v133_v35 = vmul.f32 %v117_v33, %v1141_v23 }
  0x84   :  { %v149_v37 = vrot.slane %v133_v35, 1 }
  0x85   :  { %v77_v38 = vpop.permute.xlu1 %76 }
  0x86   :  { %v165_v39 = vadd.f32 %v149_v37, %v85_v36  ;;  %v1162_v41 = vpop.permute.xlu0 %174  ;;  %v79_v15 = vperm.slane %v77_v38, 0 }
  0x88   :  { %v1164_v42 = vpop.permute.xlu2 %169  ;;  %397 = vperm.xlu1 %956, %v1045_v0  }
  0x89   :  { %402 = vperm.xlu2 %954, %v1065_v5   ;;  %656 = vperm.xlu0 %963, %v30_v40  }
  0x8e   :  { %v100_v43 = vpop.permute.xlu1 %99  ;;  %v1168_v44 = vpop.permute.xlu0 %199 }
  0x8f   :  { %v102_v46 = vperm.slane %v100_v43, 0 }
  0x90   :  { %v185_v47 = vpop.permute.xlu2 %184  ;;  %412 = vperm.xlu1 %956, %v1083_v8  }
  0x91   :  { %v130_v48 = vmul.f32 %v102_v46, %v1141_v23  ;;  %v187_v49 = vperm.slane %v185_v47, 0  ;;  %957 = vset.pattern.permute.xlu2 %v1016_v13  ;;  %966 = vset.pattern.permute.xlu0 %v1018_v16 }
  0x92   :  { %457 = vperm.xlu2 %957, %v1088_v9   ;;  %334 = vperm.xlu0 %966, %v1056_v4  }
  0x93   :  { %v146_v51 = vrot.slane %v130_v48, 1  ;;  %v211_v52 = vmul.f32 %v187_v49, %v1141_v23 }
  0x95   :  { %v162_v53 = vadd.f32 %v146_v51, %v82_v50  ;;  %v227_v54 = vrot.slane %v211_v52, 2 }
  0x96   :  { %v110_v55 = vpop.permute.xlu1 %109 }
  0x97   :  { %v112_v57 = vperm.slane %v110_v55, 0  ;;  %v1179_v58 = vpop.permute.xlu0 %254  ;;  %v243_v59 = vadd.f32 %v227_v54, %v163_v34 }
  0x98   :  { %v195_v60 = vpop.permute.xlu2 %194  ;;  %959 = vset.pattern.permute.xlu1 %v1016_v13 }
  0x99   :  { %v132_v61 = vmul.f32 %v112_v57, %v1141_v23  ;;  %v197_v62 = vperm.slane %v195_v60, 0  ;;  %467 = vperm.xlu1 %959, %v1050_v1  }
  0x9a   :  { %472 = vperm.xlu2 %957, %v1070_v6   ;;  %359 = vperm.xlu0 %966, %v1075_v7   ;;  %v87_v7 = vmul.f32 %v79_v15, %v1141_v23 }
  0x9b   :  { %v148_v2 = vrot.slane %v132_v61, 1  ;;  %v213_v4 = vmul.f32 %v197_v62, %v1141_v23 }
  0x9d   :  { %v164_v10 = vadd.f32 %v148_v2, %v84_v63  ;;  %v229_v11 = vrot.slane %v213_v4, 2  ;;  %v1233_v63 = vld [vmem:[%s1404_s2 + $0x10] sm:$0xff] }
  0x9e   :  { %v125_v12 = vpop.permute.xlu1 %124 }
  0x9f   :  { %v127_v17 = vperm.slane %v125_v12, 0  ;;  %v1188_v13 = vpop.permute.xlu0 %279  ;;  %v245_v19 = vadd.f32 %v229_v11, %v165_v39 }
  0xa1   :  { %v135_v21 = vmul.f32 %v127_v17, %v1141_v23  ;;  %v1191_v22 = vpop.permute.xlu2 %249  ;;  %477 = vperm.xlu1 %959, %v1045_v0  }
  0xa2   :  { %482 = vperm.xlu2 %957, %v1065_v5   ;;  %685 = vperm.xlu0 %966, %v1151_v29  }
  0xa3   :  { %v151_v24 = vrot.slane %v135_v21, 1  ;;  %v1258_v21 = vld [vmem:[%s1404_s2 + $0x28] sm:$0xff] }
  0xa5   :  { %v167_v25 = vadd.f32 %v151_v24, %v87_v7 }
  0xa7   :  { %v180_v27 = vpop.permute.xlu1 %179 }
  0xa8   :  { %v182_v28 = vperm.slane %v180_v27, 0  ;;  %v1197_v30 = vpop.permute.xlu0 %382 }
  0xa9   :  { %v265_v31 = vpop.permute.xlu2 %264  ;;  %492 = vperm.xlu1 %959, %v1083_v8  }
  0xaa   :  { %v210_v32 = vmul.f32 %v182_v28, %v1141_v23  ;;  %v267_v33 = vperm.slane %v265_v31, 0  ;;  %960 = vset.pattern.permute.xlu2 %v1017_v14  ;;  %705 = vperm.xlu0 %966, %v30_v40  }
  0xab   :  { %537 = vperm.xlu2 %960, %v1088_v9  }
  0xac   :  { %v226_v29 = vrot.slane %v210_v32, 2  ;;  %v291_v34 = vmul.f32 %v267_v33, %v1141_v23  ;;  %v92_v32 = vperm.slane %v1130_v18, 0  ;;  %v252_v18 = vperm.slane %v1191_v22, 0 }
  0xae   :  { %v307_v35 = vrot.slane %v291_v34, 3  ;;  %v242_v36 = vadd.f32 %v226_v29, %v162_v53  ;;  %v172_v34 = vperm.slane %v1164_v42, 0 }
  0xaf   :  { %v190_v37 = vpop.permute.xlu1 %189 }
  0xb0   :  { %v192_v38 = vperm.slane %v190_v37, 0  ;;  %v1204_v39 = vpop.permute.xlu0 %407  ;;  %v1206_v43 = vadd.f32 %v307_v35, %v243_v59  ;;  %v24_v59 = vld [vmem:[%s1404_s2] sm:$0xff]  ;;  %v1274_v37 = vld [vmem:[%s1404_s2 + $0x38] sm:$0xff] }
  0xb1   :  { %v275_v45 = vpop.permute.xlu2 %274  ;;  %962 = vset.pattern.permute.xlu1 %v1017_v14 }
  0xb2   :  { %v212_v46 = vmul.f32 %v192_v38, %v1141_v23  ;;  %v277_v47 = vperm.slane %v275_v45, 0  ;;  %547 = vperm.xlu1 %962, %v1050_v1   ;;  %v128_v45 = vmul.f32 %v92_v32, %v1141_v23 }
  0xb3   :  { %552 = vperm.xlu2 %960, %v1070_v6  }
  0xb4   :  { %v228_v9 = vrot.slane %v212_v46, 2  ;;  %v293_v40 = vmul.f32 %v277_v47, %v1141_v23 }
  0xb6   :  { %v309_v48 = vrot.slane %v293_v40, 3  ;;  %v244_v49 = vadd.f32 %v228_v9, %v164_v10  ;;  %v208_v9 = vmul.f32 %v172_v34, %v1141_v23 }
  0xb7   :  { %v205_v50 = vpop.permute.xlu1 %204 }
  0xb8   :  { %v207_v51 = vperm.slane %v205_v50, 0  ;;  %v1213_v52 = vadd.f32 %v309_v48, %v245_v19  ;;  %v1253_v19 = vld [vmem:[%s1404_s2 + $0x20] sm:$0xff]  ;;  %v97_v50 = vperm.slane %v1135_v20, 0  ;;  %v257_v20 = vperm.slane %v1179_v58, 0 }
  0xb9   :  { %v1215_v53 = vpop.permute.xlu0 %462  ;;  %v122_v58 = vperm.slane %v1146_v26, 0 }
  0xba   :  { %v215_v14 = vmul.f32 %v207_v51, %v1141_v23  ;;  %557 = vperm.xlu1 %962, %v1045_v0   ;;  %v330_v54 = vpop.permute.xlu2 %329  ;;  %v144_v51 = vrot.slane %v128_v45, 1 }
  0xbb   :  { %562 = vperm.xlu2 %960, %v1065_v5   ;;  %v332_v27 = vperm.slane %v330_v54, 0 }
  0xbc   :  { %v231_v1 = vrot.slane %v215_v14, 2  ;;  %v288_v14 = vmul.f32 %v252_v18, %v1141_v23 }
  0xbd   :  { %v368_v35 = vmul.f32 %v332_v27, %v1141_v23 }
  0xbe   :  { %v247_v6 = vadd.f32 %v231_v1, %v167_v25  ;;  %v177_v1 = vperm.slane %v1162_v41, 0 }
  0xc0   :  { %v260_v55 = vpop.permute.xlu1 %259 }
  0xc1   :  { %v262_v56 = vperm.slane %v260_v55, 0  ;;  %v1220_v57 = vpop.permute.xlu0 %487 }
  0xc2   :  { %572 = vperm.xlu1 %962, %v1083_v8   ;;  %v345_v60 = vpop.permute.xlu2 %344  ;;  %v1238_v8 = vld [vmem:[%s1404_s2 + $0x18] sm:$0xff]  ;;  %s1019_s2 = smov [#allocation2]  }
  0xc3   :  { %v290_v61 = vmul.f32 %v262_v56, %v1141_v23  ;;  %964 = vset.pattern.permute.xlu2 %v1012_v3  ;;  %v347_v40 = vperm.slane %v345_v60, 0  ;;  %s916_s17 = sshll.u32 %s1019_s2, 4  ;;  %s917_s17 = int_to_ptr.vmem [resolvable:$true] %s916_s17 }
  0xc4   :  { %626 = vperm.xlu2 %964, %v24_v59  }
  0xc5   :  { %v306_v0 = vrot.slane %v290_v61, 3  ;;  %v371_v55 = vmul.f32 %v347_v40, %v1141_v23  ;;  %v129_v61 = vmul.f32 %v97_v50, %v1141_v23 }
  0xc7   :  { %v1228_v5 = vadd.f32 %v306_v0, %v242_v36  ;;  %v145_v27 = vrot.slane %v129_v61, 1 }
  0xc8   :  { %v270_v62 = vpop.permute.xlu1 %269 }
  0xc9   :  { %v272_v2 = vperm.slane %v270_v62, 0 }
  0xca   :  { %965 = vset.pattern.permute.xlu1 %v1012_v3  ;;  %v1241_v4 = vpop.permute.xlu2 %354  ;;  %v1243_v10 = vpop.permute.xlu0 %542 }
  0xcb   :  { %v292_v11 = vmul.f32 %v272_v2, %v1141_v23  ;;  %636 = vperm.xlu1 %965, %v1233_v63  }
  0xcc   :  { %641 = vperm.xlu2 %964, %v1238_v8  }
  0xcd   :  { %v308_v12 = vrot.slane %v292_v11, 3  ;;  %v209_v11 = vmul.f32 %v177_v1, %v1141_v23 }
  0xcf   :  { %v1248_v15 = vadd.f32 %v308_v12, %v244_v49  ;;  %v225_v32 = vrot.slane %v209_v11, 2 }
  0xd0   :  { %v285_v17 = vpop.permute.xlu1 %284 }
  0xd1   :  { %v287_v3 = vperm.slane %v285_v17, 0  ;;  %v357_v17 = vperm.slane %v1241_v4, 0  ;;  %v202_v4 = vperm.slane %v1168_v44, 0 }
  0xd2   :  { %v1260_v7 = vpop.permute.xlu0 %567 }
  0xd3   :  { %v295_v24 = vmul.f32 %v287_v3, %v1141_v23  ;;  %v378_v25 = vpop.permute.xlu2 %377  ;;  %646 = vperm.xlu1 %965, %v1253_v19  }
  0xd4   :  { %v380_v28 = vperm.slane %v378_v25, 0  ;;  %651 = vperm.xlu2 %964, %v1258_v21  }
  0xd5   :  { %v311_v31 = vrot.slane %v295_v24, 3 }
  0xd6   :  { %v416_v33 = vmul.f32 %v380_v28, %v1141_v23  ;;  %v289_v28 = vmul.f32 %v257_v20, %v1141_v23 }
  0xd7   :  { %v1267_v29 = vadd.f32 %v311_v31, %v247_v6  ;;  %v224_v6 = vrot.slane %v208_v9, 2 }
  0xd8   :  { %v432_v36 = vrot.slane %v416_v33, 1  ;;  %v373_v33 = vmul.f32 %v357_v17, %v1141_v23  ;;  %v305_v26 = vrot.slane %v289_v28, 3 }
  0xd9   :  { %v1276_v38 = vpop.permute.xlu1 %339 }
  0xda   :  { %v1280_v46 = vadd.f32 %v432_v36, %v368_v35  ;;  %v134_v35 = vmul.f32 %v122_v58, %v1141_v23  ;;  %v342_v1 = vperm.slane %v1276_v38, 0 }
  0xdb   :  { %v393_v47 = vpop.permute.xlu2 %392  ;;  %661 = vperm.xlu1 %965, %v1274_v37   ;;  %v35_v42 = vpop.permute.xlu0 %34 }
  0xdc   :  { %v395_v48 = vperm.slane %v393_v47, 0  ;;  %v37_v49 = vperm.slane %v35_v42, 0  ;;  %967 = vset.pattern.permute.xlu2 %v1018_v16  ;;  %v214_v42 = vmul.f32 %v202_v4, %v1141_v23 }
  0xdd   :  { %681 = vperm.xlu2 %967, %v24_v59   ;;  %v304_v59 = vrot.slane %v288_v14, 3 }
  0xde   :  { %v419_v22 = vmul.f32 %v395_v48, %v1141_v23  ;;  %v80_v54 = vmul.f32 %v37_v49, %v1141_v23  ;;  %v150_v48 = vrot.slane %v134_v35, 1  ;;  %v230_v50 = vrot.slane %v214_v42, 2 }
  0xe0   :  { %v435_v56 = vrot.slane %v419_v22, 1  ;;  %v160_v60 = vadd.f32 %v144_v51, %v80_v54 }
  0xe1   :  { %v1292_v0 = vpop.permute.xlu1 %349 }
  0xe2   :  { %v1295_v62 = vadd.f32 %v435_v56, %v371_v55  ;;  %v240_v2 = vadd.f32 %v224_v6, %v160_v60  ;;  %v370_v60 = vmul.f32 %v342_v1, %v1141_v23  ;;  %v352_v11 = vperm.slane %v1292_v0, 0 }
  0xe3   :  { %v403_v12 = vpop.permute.xlu2 %402  ;;  %968 = vset.pattern.permute.xlu1 %v1018_v16  ;;  %v41_v41 = vpop.permute.xlu0 %40 }
  0xe4   :  { %v405_v3 = vperm.slane %v403_v12, 0  ;;  %v43_v24 = vperm.slane %v41_v41, 0  ;;  %689 = vperm.xlu1 %968, %v1233_v63   ;;  %v1301_v25 = vadd.f32 %v304_v59, %v240_v2  ;;  %v372_v58 = vmul.f32 %v352_v11, %v1141_v23 }
  0xe5   :  { %693 = vperm.xlu2 %967, %v1238_v8   ;;  %v282_v8 = vperm.slane %v1188_v13, 0 }
  0xe6   :  { %v421_v31 = vmul.f32 %v405_v3, %v1141_v23  ;;  %v81_v16 = vmul.f32 %v43_v24, %v1141_v23  ;;  %v465_v24 = vperm.slane %v1215_v53, 0 }
  0xe7   :  { %v294_v49 = vmul.f32 %v282_v8, %v1141_v23 }
  0xe8   :  { %v437_v34 = vrot.slane %v421_v31, 1  ;;  %v161_v63 = vadd.f32 %v145_v27, %v81_v16  ;;  %v497_v0 = vmul.f32 %v465_v24, %v1141_v23 }
  0xe9   :  { %v365_v36 = vpop.permute.xlu1 %364  ;;  %v310_v14 = vrot.slane %v294_v49, 3 }
  0xea   :  { %v1312_v45 = vadd.f32 %v437_v34, %v373_v33  ;;  %v241_v18 = vadd.f32 %v225_v32, %v161_v63  ;;  %v545_v32 = vperm.slane %v1243_v10, 0  ;;  %v367_v4 = vperm.slane %v365_v36, 0 }
  0xeb   :  { %v71_v47 = vpop.permute.xlu0 %70  ;;  %v513_v8 = vrot.slane %v497_v0, 2  ;;  %v490_v10 = vperm.slane %v1220_v57, 0  ;;  %v570_v36 = vperm.slane %v1260_v7, 0 }
  0xec   :  { %v73_v9 = vperm.slane %v71_v47, 0  ;;  %v1315_v40 = vpop.permute.xlu2 %457  ;;  %697 = vperm.xlu1 %968, %v1253_v19   ;;  %v1318_v44 = vadd.f32 %v305_v26, %v241_v18  ;;  %v410_v26 = vperm.slane %v1204_v39, 0  ;;  %v577_v18 = vmul.f32 %v545_v32, %v1141_v23 }
  0xed   :  { %701 = vperm.xlu2 %967, %v1258_v21   ;;  %v375_v47 = vmul.f32 %v367_v4, %v1141_v23 }
  0xee   :  { %v86_v13 = vmul.f32 %v73_v9, %v1141_v23 }
  0xf0   :  { %v166_v51 = vadd.f32 %v150_v48, %v86_v13  ;;  %v422_v13 = vmul.f32 %v410_v26, %v1141_v23 }
  0xf2   :  { %v388_v22 = vpop.permute.xlu1 %387  ;;  %v246_v54 = vadd.f32 %v230_v50, %v166_v51  ;;  %v593_v50 = vrot.slane %v577_v18, 3 }
  0xf3   :  { %v390_v6 = vperm.slane %v388_v22, 0  ;;  %v632_v55 = vpop.permute.xlu0 %631  ;;  %v502_v22 = vmul.f32 %v490_v10, %v1141_v23 }
  0xf4   :  { %v1324_v56 = vpop.permute.xlu2 %472  ;;  %709 = vperm.xlu1 %968, %v1274_v37   ;;  %v326_v19 = vadd.f32 %v310_v14, %v246_v54  ;;  %v385_v37 = vperm.slane %v1197_v30, 0  ;;  %v582_v54 = vmul.f32 %v570_v36, %v1141_v23 }
  0xf5   :  { %v418_v21 = vmul.f32 %v390_v6, %v1141_v23 }
  0xf6   :  { %v622_v2 = vperm.slane %v326_v19, 0  ;;  %v417_v31 = vmul.f32 %v385_v37, %v1141_v23  ;;  %v438_v19 = vrot.slane %v422_v13, 1 }
  0xf7   :  { %v434_v61 = vrot.slane %v418_v21, 1  ;;  %v518_v21 = vrot.slane %v502_v22, 2  ;;  %v616_v22 = vperm.slane %v1301_v25, 0  ;;  %v619_v25 = vperm.slane %v1206_v43, 0 }
  0xf8   :  { %v433_v53 = vrot.slane %v417_v31, 1 }
  0xf9   :  { %v1329_v20 = vadd.f32 %v434_v61, %v370_v60  ;;  %v598_v60 = vrot.slane %v582_v54, 3  ;;  %v617_v61 = vperm.slane %v1318_v44, 0 }
  0xfa   :  { %v398_v59 = vpop.permute.xlu1 %397 }
  0xfb   :  { %v400_v12 = vperm.slane %v398_v59, 0  ;;  %v657_v38 = vpop.permute.xlu0 %656 }
  0xfc   :  { %v670_v41 = vsub.f32 %v622_v2, %v657_v38  ;;  %v1332_v17 = vpop.permute.xlu2 %482  ;;  %v665_v2 = vsub.f32 %v617_v61, %v632_v55 }
  0xfd   :  { %v420_v3 = vmul.f32 %v400_v12, %v1141_v23 }
  0xff   :  { %v436_v27 = vrot.slane %v420_v3, 1 }
 0x101   :  { %v1338_v28 = vadd.f32 %v436_v27, %v372_v58  ;;  %v721_v27 = vmul.f32 %v665_v2, %v665_v2 }
 0x102   :  { %v413_v16 = vpop.permute.xlu1 %412 }
 0x103   :  { %v415_v33 = vperm.slane %v413_v16, 0 }
 0x104   :  { %v335_v34 = vpop.permute.xlu0 %334 }
 0x105   :  { %v423_v63 = vmul.f32 %v415_v33, %v1141_v23  ;;  %v337_v30 = vperm.slane %v335_v34, 0  ;;  %v538_v35 = vpop.permute.xlu2 %537  ;;  %v726_v34 = vmul.f32 %v670_v41, %v670_v41 }
 0x106   :  { %v540_v26 = vperm.slane %v538_v35, 0 }
 0x107   :  { %v439_v42 = vrot.slane %v423_v63, 1  ;;  %v369_v9 = vmul.f32 %v337_v30, %v1141_v23  ;;  %v460_v30 = vperm.slane %v1315_v40, 0 }
 0x109   :  { %v1350_v48 = vadd.f32 %v439_v42, %v375_v47  ;;  %v449_v49 = vadd.f32 %v433_v53, %v369_v9  ;;  %v496_v18 = vmul.f32 %v460_v30, %v1141_v23  ;;  %v576_v47 = vmul.f32 %v540_v26, %v1141_v23 }
 0x10a   :  { %v475_v9 = vperm.slane %v1324_v56, 0 }
 0x10b   :  { %v1353_v51 = vpop.permute.xlu1 %467  ;;  %v529_v39 = vadd.f32 %v513_v8, %v449_v49  ;;  %v512_v42 = vrot.slane %v496_v18, 2  ;;  %v592_v36 = vrot.slane %v576_v47, 3 }
 0x10c   :  { %v360_v14 = vpop.permute.xlu0 %359  ;;  %v499_v41 = vmul.f32 %v475_v9, %v1141_v23 }
 0x10d   :  { %v362_v1 = vperm.slane %v360_v14, 0  ;;  %v553_v6 = vpop.permute.xlu2 %552  ;;  %v609_v7 = vadd.f32 %v593_v50, %v529_v39  ;;  %v528_v50 = vadd.f32 %v512_v42, %v1280_v46  ;;  %v485_v14 = vperm.slane %v1332_v17, 0 }
 0x10e   :  { %v555_v49 = vperm.slane %v553_v6, 0  ;;  %v515_v35 = vrot.slane %v499_v41, 2 }
 0x10f   :  { %v374_v57 = vmul.f32 %v362_v1, %v1141_v23  ;;  %v673_v12 = vperm.slane %v609_v7, 0  ;;  %v608_v39 = vadd.f32 %v592_v36, %v528_v50  ;;  %v501_v7 = vmul.f32 %v485_v14, %v1141_v23 }
 0x110   :  { %v579_v40 = vmul.f32 %v555_v49, %v1141_v23  ;;  %v531_v46 = vadd.f32 %v515_v35, %v1295_v62  ;;  %v618_v14 = vperm.slane %v1228_v5, 0 }
 0x111   :  { %v454_v59 = vadd.f32 %v438_v19, %v374_v57  ;;  %v672_v57 = vperm.slane %v608_v39, 0  ;;  %v517_v17 = vrot.slane %v501_v7, 2 }
 0x112   :  { %v595_v1 = vrot.slane %v579_v40, 3 }
 0x113   :  { %v1359_v11 = vpop.permute.xlu1 %477  ;;  %v534_v38 = vadd.f32 %v518_v21, %v454_v59 }
 0x114   :  { %v686_v3 = vpop.permute.xlu0 %685  ;;  %v611_v2 = vadd.f32 %v595_v1, %v531_v46  ;;  %v480_v36 = vperm.slane %v1359_v11, 0 }
 0x115   :  { %v713_v37 = vsub.f32 %v673_v12, %v686_v3  ;;  %v563_v24 = vpop.permute.xlu2 %562  ;;  %v614_v58 = vadd.f32 %v598_v60, %v534_v38 }
 0x116   :  { %v565_v56 = vperm.slane %v563_v24, 0  ;;  %v675_v24 = vperm.slane %v611_v2, 0 }
 0x117   :  { %v729_v31 = vmul.f32 %v713_v37, %v713_v37  ;;  %v678_v32 = vperm.slane %v614_v58, 0 }
 0x118   :  { %v581_v60 = vmul.f32 %v565_v56, %v1141_v23 }
 0x119   :  { %v737_v0 = vadd.f32 %v729_v31, %v721_v27  ;;  %v533_v31 = vadd.f32 %v517_v17, %v1312_v45 }
 0x11a   :  { %v597_v3 = vrot.slane %v581_v60, 3 }
 0x11b   :  { %v1361_v16 = vpop.permute.xlu1 %492  ;;  %746 = vmin.xlane.f32.xlu0 %v737_v0 }
 0x11c   :  { %v706_v4 = vpop.permute.xlu0 %705  ;;  %v495_v35 = vperm.slane %v1361_v16, 0  ;;  %v620_v16 = vperm.slane %v1248_v15, 0 }
 0x11d   :  { %v718_v33 = vsub.f32 %v678_v32, %v706_v4  ;;  %v613_v32 = vadd.f32 %v597_v3, %v533_v31  ;;  %v470_v4 = vperm.slane %v1353_v51, 0 }
 0x11e   :  { %v627_v44 = vpop.permute.xlu2 %626 }
 0x11f   :  { %v734_v55 = vmul.f32 %v718_v33, %v718_v33  ;;  %v664_v19 = vsub.f32 %v616_v22, %v627_v44  ;;  %v621_v33 = vperm.slane %v1213_v52, 0  ;;  %v677_v30 = vperm.slane %v613_v32, 0 }
 0x120   :  { %v498_v26 = vmul.f32 %v470_v4, %v1141_v23 }
 0x121   :  { %v1363_v63 = vadd.f32 %v734_v55, %v726_v34  ;;  %v720_v61 = vmul.f32 %v664_v19, %v664_v19  ;;  %v503_v19 = vmul.f32 %v495_v35, %v1141_v23 }
 0x122   :  { %v514_v9 = vrot.slane %v498_v26, 2 }
 0x123   :  { %v519_v60 = vrot.slane %v503_v19, 2 }
 0x124   :  { %v548_v53 = vpop.permute.xlu1 %547 }
 0x125   :  { %v550_v34 = vperm.slane %v548_v53, 0  ;;  %v500_v53 = vmul.f32 %v480_v36, %v1141_v23 }
 0x126   :  { %v642_v8 = vpop.permute.xlu2 %641 }
 0x127   :  { %v667_v37 = vsub.f32 %v619_v25, %v642_v8  ;;  %v578_v47 = vmul.f32 %v550_v34, %v1141_v23  ;;  %v516_v39 = vrot.slane %v500_v53, 2  ;;  %v535_v25 = vadd.f32 %v519_v60, %v1350_v48 }
 0x129   :  { %v723_v0 = vmul.f32 %v667_v37, %v667_v37  ;;  %v594_v49 = vrot.slane %v578_v47, 3 }
 0x12c   :  { %v558_v10 = vpop.permute.xlu1 %557 }
 0x12d   :  { %v560_v52 = vperm.slane %v558_v10, 0 }
 0x12e   :  { %v652_v13 = vpop.permute.xlu2 %651 }
 0x12f   :  { %v669_v55 = vsub.f32 %v621_v33, %v652_v13  ;;  %v530_v13 = vadd.f32 %v514_v9, %v1329_v20  ;;  %v580_v50 = vmul.f32 %v560_v52, %v1141_v23 }
 0x131   :  { %v725_v45 = vmul.f32 %v669_v55, %v669_v55  ;;  %v610_v40 = vadd.f32 %v594_v49, %v530_v13  ;;  %v596_v22 = vrot.slane %v580_v50, 3 }
 0x133   :  { %v674_v56 = vperm.slane %v610_v40, 0 }
 0x134   :  { %v1374_v54 = vpop.permute.xlu1 %572 }
 0x135   :  { %v575_v11 = vperm.slane %v1374_v54, 0 }
 0x137   :  { %v682_v6 = vpop.permute.xlu2 %681  ;;  %v583_v20 = vmul.f32 %v575_v11, %v1141_v23  ;;  %v623_v23 = vperm.slane %v1267_v29, 0 }
 0x138   :  { %v712_v21 = vsub.f32 %v672_v57, %v682_v6  ;;  %v532_v6 = vadd.f32 %v516_v39, %v1338_v28 }
 0x13a   :  { %v728_v59 = vmul.f32 %v712_v21, %v712_v21  ;;  %v612_v46 = vadd.f32 %v596_v22, %v532_v6 }
 0x13c   :  { %v736_v12 = vadd.f32 %v728_v59, %v720_v61  ;;  %v599_v61 = vrot.slane %v583_v20, 3  ;;  %v676_v54 = vperm.slane %v612_v46, 0 }
 0x13d   :  { %v637_v38 = vpop.permute.xlu1 %636 }
 0x13e   :  { %744 = vmin.xlane.f32.xlu2 %v736_v12  ;;  %v666_v1 = vsub.f32 %v618_v14, %v637_v38  ;;  %v615_v28 = vadd.f32 %v599_v61, %v535_v25 }
 0x13f   :  { %v694_v58 = vpop.permute.xlu2 %693 }
 0x140   :  { %v715_v27 = vsub.f32 %v675_v24, %v694_v58  ;;  %v722_v7 = vmul.f32 %v666_v1, %v666_v1  ;;  %v679_v15 = vperm.slane %v615_v28, 0 }
 0x142   :  { %v731_v62 = vmul.f32 %v715_v27, %v715_v27 }
 0x144   :  { %v739_v44 = vadd.f32 %v731_v62, %v723_v0 }
 0x145   :  { %v647_v43 = vpop.permute.xlu1 %646 }
 0x146   :  { %750 = vmin.xlane.f32.xlu2 %v739_v44  ;;  %v668_v59 = vsub.f32 %v620_v16, %v647_v43 }
 0x147   :  { %v702_v8 = vpop.permute.xlu2 %701 }
 0x148   :  { %v717_v18 = vsub.f32 %v677_v30, %v702_v8  ;;  %v724_v12 = vmul.f32 %v668_v59, %v668_v59 }
 0x14a   :  { %v733_v42 = vmul.f32 %v717_v18, %v717_v18 }
 0x14c   :  { %v741_v51 = vadd.f32 %v733_v42, %v725_v45 }
 0x14d   :  { %v662_v41 = vpop.permute.xlu1 %661 }
 0x14e   :  { %754 = vmin.xlane.f32.xlu0 %v741_v51  ;;  %v671_v37 = vsub.f32 %v623_v23, %v662_v41 }
 0x150   :  { %v727_v27 = vmul.f32 %v671_v37, %v671_v37 }
 0x156   :  { %v690_v10 = vpop.permute.xlu1 %689 }
 0x157   :  { %v714_v57 = vsub.f32 %v674_v56, %v690_v10 }
 0x159   :  { %v730_v21 = vmul.f32 %v714_v57, %v714_v57 }
 0x15b   :  { %v738_v5 = vadd.f32 %v730_v21, %v722_v7 }
 0x15d   :  { %748 = vmin.xlane.f32.xlu1 %v738_v5 }
 0x15e   :  { %v698_v2 = vpop.permute.xlu1 %697 }
 0x15f   :  { %v716_v17 = vsub.f32 %v676_v54, %v698_v2 }
 0x161   :  { %v732_v38 = vmul.f32 %v716_v17, %v716_v17 }
 0x163   :  { %v740_v3 = vadd.f32 %v732_v38, %v724_v12 }
 0x165   :  { %756 = vmin.xlane.f32.xlu1 %v1363_v63  ;;  %752 = vmin.xlane.f32.xlu2 %v740_v3 }
 0x166   :  { %v710_v24 = vpop.permute.xlu1 %709 }
 0x167   :  { %v719_v58 = vsub.f32 %v679_v15, %v710_v24 }
 0x169   :  { %v735_v31 = vmul.f32 %v719_v58, %v719_v58 }
 0x16b   :  { %v743_v0 = vadd.f32 %v735_v31, %v727_v27 }
 0x16d   :  { %758 = vmin.xlane.f32.xlu2 %v743_v0 }
 0x18e   :  { %v747_v62 = vpop.xlane.xlu0 %746 }
 0x18f   :  { %969 = vrsqrt.f32 %v747_v62  ;;  %vm779_vm0 = vcmp.eq.f32.partialorder %v747_v62, inf  ;;  %v782_v43 = vand.u32 2147483648, %v747_v62  ;;  %vm781_vm1 = vcmp.eq.f32.partialorder %v747_v62, 0.0 }
 0x195   :  { %v970_v48 = vpop.eup %969 }
 0x196   :  { %v773_v32 = vmul.f32 %v970_v48, %v747_v62 }
 0x198   :  { %v774_v4 = vmul.f32 %v970_v48, %v773_v32 }
 0x19a   :  { %v775_v33 = vmul.f32 0.5, %v774_v4 }
 0x19c   :  { %v776_v44 = vsub.f32 1.5, %v775_v33 }
 0x19e   :  { %v777_v29 = vmul.f32 %v970_v48, %v776_v44 }
 0x1a0   :  { %v778_v34 = vmul.f32 %v777_v29, %v747_v62 }
 0x1a2   :  { %v780_v63 = vsel %vm779_vm0, %v747_v62, %v778_v34 }
 0x1a3   :  { %v783_v55 = vsel %vm781_vm1, %v782_v43, %v780_v63 }
 0x1a4   :  { %v862_v30 = vrot.slane %v783_v55, 4 }
 0x1a6   :  { %v863_v26 = vadd.f32 %v862_v30, %v783_v55 }
 0x1a8   :  { %v864_v8 = vrot.slane %v863_v26, 2 }
 0x1aa   :  { %v865_v18 = vadd.f32 %v864_v8, %v863_v26 }
 0x1ac   :  { %v866_v47 = vrot.slane %v865_v18, 1 }
 0x1ae   :  { %v867_v45 = vadd.f32 %v866_v47, %v865_v18 }
 0x1b0   :  { %905 = vst [vmem:[#allocation2 + $0x1] sm:$0x1] %v867_v45 }
 0x1b1   :  { %v745_v42 = vpop.xlane.xlu2 %744 }
 0x1b2   :  { %971 = vrsqrt.f32 %v745_v42  ;;  %vm767_vm2 = vcmp.eq.f32.partialorder %v745_v42, inf  ;;  %v770_v14 = vand.u32 2147483648, %v745_v42  ;;  %vm769_vm3 = vcmp.eq.f32.partialorder %v745_v42, 0.0 }
 0x1b8   :  { %v972_v9 = vpop.eup %971 }
 0x1b9   :  { %v761_v36 = vmul.f32 %v972_v9, %v745_v42  ;;  %v751_v51 = vpop.xlane.xlu2 %750 }
 0x1ba   :  { %973 = vrsqrt.f32 %v751_v51  ;;  %vm803_vm4 = vcmp.eq.f32.partialorder %v751_v51, inf  ;;  %v806_v60 = vand.u32 2147483648, %v751_v51  ;;  %vm805_vm5 = vcmp.eq.f32.partialorder %v751_v51, 0.0 }
 0x1bb   :  { %v762_v49 = vmul.f32 %v972_v9, %v761_v36 }
 0x1bd   :  { %v763_v52 = vmul.f32 0.5, %v762_v49 }
 0x1bf   :  { %v764_v41 = vsub.f32 1.5, %v763_v52 }
 0x1c0   :  { %v974_v53 = vpop.eup %973 }
 0x1c1   :  { %v765_v13 = vmul.f32 %v972_v9, %v764_v41  ;;  %v797_v50 = vmul.f32 %v974_v53, %v751_v51  ;;  %v755_v40 = vpop.xlane.xlu0 %754 }
 0x1c2   :  { %975 = vrsqrt.f32 %v755_v40  ;;  %vm827_vm6 = vcmp.eq.f32.partialorder %v755_v40, inf  ;;  %v830_v37 = vand.u32 2147483648, %v755_v40  ;;  %vm829_vm7 = vcmp.eq.f32.partialorder %v755_v40, 0.0 }
 0x1c3   :  { %v766_v39 = vmul.f32 %v765_v13, %v745_v42  ;;  %v798_v35 = vmul.f32 %v974_v53, %v797_v50 }
 0x1c5   :  { %v768_v22 = vsel %vm767_vm2, %v745_v42, %v766_v39  ;;  %v799_v11 = vmul.f32 0.5, %v798_v35 }
 0x1c6   :  { %v771_v1 = vsel %vm769_vm3, %v770_v14, %v768_v22 }
 0x1c7   :  { %v856_v56 = vrot.slane %v771_v1, 4  ;;  %v800_v10 = vsub.f32 1.5, %v799_v11 }
 0x1c8   :  { %v976_v19 = vpop.eup %975 }
 0x1c9   :  { %v857_v57 = vadd.f32 %v856_v56, %v771_v1  ;;  %v801_v6 = vmul.f32 %v974_v53, %v800_v10  ;;  %v821_v20 = vmul.f32 %v976_v19, %v755_v40 }
 0x1cb   :  { %v858_v7 = vrot.slane %v857_v57, 2  ;;  %v802_v21 = vmul.f32 %v801_v6, %v751_v51  ;;  %v822_v46 = vmul.f32 %v976_v19, %v821_v20 }
 0x1cd   :  { %v859_v16 = vadd.f32 %v858_v7, %v857_v57  ;;  %v804_v5 = vsel %vm803_vm4, %v751_v51, %v802_v21  ;;  %v823_v61 = vmul.f32 0.5, %v822_v46 }
 0x1ce   :  { %v807_v59 = vsel %vm805_vm5, %v806_v60, %v804_v5 }
 0x1cf   :  { %v860_v54 = vrot.slane %v859_v16, 1  ;;  %v874_v2 = vrot.slane %v807_v59, 4  ;;  %v824_v17 = vsub.f32 1.5, %v823_v61 }
 0x1d0   :  { %v749_v25 = vpop.xlane.xlu1 %748 }
 0x1d1   :  { %v861_v12 = vadd.f32 %v860_v54, %v859_v16  ;;  %v875_v38 = vadd.f32 %v874_v2, %v807_v59  ;;  %v825_v28 = vmul.f32 %v976_v19, %v824_v17  ;;  %977 = vrsqrt.f32 %v749_v25 }
 0x1d2   :  { %vm791_vm8 = vcmp.eq.f32.partialorder %v749_v25, inf  ;;  %v794_v51 = vand.u32 2147483648, %v749_v25  ;;  %vm793_vm9 = vcmp.eq.f32.partialorder %v749_v25, 0.0 }
 0x1d3   :  { %904 = vst [vmem:[#allocation2] sm:$0x1] %v861_v12  ;;  %v876_v23 = vrot.slane %v875_v38, 2  ;;  %v826_v3 = vmul.f32 %v825_v28, %v755_v40 }
 0x1d5   :  { %v877_v15 = vadd.f32 %v876_v23, %v875_v38  ;;  %v828_v24 = vsel %vm827_vm6, %v755_v40, %v826_v3 }
 0x1d6   :  { %v831_v58 = vsel %vm829_vm7, %v830_v37, %v828_v24 }
 0x1d7   :  { %v978_v27 = vpop.eup %977  ;;  %v878_v31 = vrot.slane %v877_v15, 1  ;;  %v886_v0 = vrot.slane %v831_v58, 4 }
 0x1d8   :  { %v785_v62 = vmul.f32 %v978_v27, %v749_v25  ;;  %v757_v48 = vpop.xlane.xlu1 %756  ;;  %v753_v32 = vpop.xlane.xlu2 %752 }
 0x1d9   :  { %v879_v4 = vadd.f32 %v878_v31, %v877_v15  ;;  %v887_v33 = vadd.f32 %v886_v0, %v831_v58  ;;  %979 = vrsqrt.f32 %v757_v48  ;;  %vm839_vm10 = vcmp.eq.f32.partialorder %v757_v48, inf }
 0x1da   :  { %v786_v44 = vmul.f32 %v978_v27, %v785_v62  ;;  %981 = vrsqrt.f32 %v753_v32  ;;  %vm841_vm11 = vcmp.eq.f32.partialorder %v757_v48, 0.0  ;;  %v842_v57 = vand.u32 2147483648, %v757_v48 }
 0x1db   :  { %907 = vst [vmem:[#allocation2 + $0x3] sm:$0x1] %v879_v4  ;;  %v888_v29 = vrot.slane %v887_v33, 2  ;;  %vm815_vm12 = vcmp.eq.f32.partialorder %v753_v32, inf  ;;  %v818_v21 = vand.u32 2147483648, %v753_v32  ;;  %vm817_vm13 = vcmp.eq.f32.partialorder %v753_v32, 0.0 }
 0x1dc   :  { %v787_v34 = vmul.f32 0.5, %v786_v44 }
 0x1dd   :  { %v889_v43 = vadd.f32 %v888_v29, %v887_v33 }
 0x1de   :  { %v788_v63 = vsub.f32 1.5, %v787_v34 }
 0x1df   :  { %v980_v55 = vpop.eup %979  ;;  %v890_v30 = vrot.slane %v889_v43, 1 }
 0x1e0   :  { %v982_v26 = vpop.eup %981  ;;  %v789_v8 = vmul.f32 %v978_v27, %v788_v63  ;;  %v833_v18 = vmul.f32 %v980_v55, %v757_v48  ;;  %v759_v47 = vpop.xlane.xlu2 %758 }
 0x1e1   :  { %v891_v45 = vadd.f32 %v890_v30, %v889_v43  ;;  %v809_v42 = vmul.f32 %v982_v26, %v753_v32  ;;  %983 = vrsqrt.f32 %v759_v47  ;;  %vm851_vm14 = vcmp.eq.f32.partialorder %v759_v47, inf }
 0x1e2   :  { %v790_v9 = vmul.f32 %v789_v8, %v749_v25  ;;  %v834_v36 = vmul.f32 %v980_v55, %v833_v18  ;;  %v854_v37 = vand.u32 2147483648, %v759_v47  ;;  %vm853_vm15 = vcmp.eq.f32.partialorder %v759_v47, 0.0 }
 0x1e3   :  { %909 = vst [vmem:[#allocation2 + $0x5] sm:$0x1] %v891_v45  ;;  %v810_v49 = vmul.f32 %v982_v26, %v809_v42 }
 0x1e4   :  { %v792_v52 = vsel %vm791_vm8, %v749_v25, %v790_v9  ;;  %v835_v41 = vmul.f32 0.5, %v834_v36 }
 0x1e5   :  { %v795_v53 = vsel %vm793_vm9, %v794_v51, %v792_v52  ;;  %v811_v13 = vmul.f32 0.5, %v810_v49 }
 0x1e6   :  { %v868_v50 = vrot.slane %v795_v53, 4  ;;  %v836_v40 = vsub.f32 1.5, %v835_v41 }
 0x1e7   :  { %v984_v39 = vpop.eup %983  ;;  %v812_v35 = vsub.f32 1.5, %v811_v13 }
 0x1e8   :  { %v869_v14 = vadd.f32 %v868_v50, %v795_v53  ;;  %v837_v22 = vmul.f32 %v980_v55, %v836_v40  ;;  %v845_v11 = vmul.f32 %v984_v39, %v759_v47 }
 0x1e9   :  { %v813_v1 = vmul.f32 %v982_v26, %v812_v35 }
 0x1ea   :  { %v870_v56 = vrot.slane %v869_v14, 2  ;;  %v838_v10 = vmul.f32 %v837_v22, %v757_v48  ;;  %v846_v19 = vmul.f32 %v984_v39, %v845_v11 }
 0x1eb   :  { %v814_v6 = vmul.f32 %v813_v1, %v753_v32 }
 0x1ec   :  { %v871_v20 = vadd.f32 %v870_v56, %v869_v14  ;;  %v840_v7 = vsel %vm839_vm10, %v757_v48, %v838_v10  ;;  %v847_v46 = vmul.f32 0.5, %v846_v19 }
 0x1ed   :  { %v843_v60 = vsel %vm841_vm11, %v842_v57, %v840_v7  ;;  %v816_v16 = vsel %vm815_vm12, %v753_v32, %v814_v6 }
 0x1ee   :  { %v872_v5 = vrot.slane %v871_v20, 1  ;;  %v892_v61 = vrot.slane %v843_v60, 4  ;;  %v819_v59 = vsel %vm817_vm13, %v818_v21, %v816_v16  ;;  %v848_v54 = vsub.f32 1.5, %v847_v46 }
 0x1ef   :  { %v880_v2 = vrot.slane %v819_v59, 4 }
 0x1f0   :  { %v873_v17 = vadd.f32 %v872_v5, %v871_v20  ;;  %v893_v25 = vadd.f32 %v892_v61, %v843_v60  ;;  %v849_v12 = vmul.f32 %v984_v39, %v848_v54 }
 0x1f1   :  { %v881_v38 = vadd.f32 %v880_v2, %v819_v59 }
 0x1f2   :  { %906 = vst [vmem:[#allocation2 + $0x2] sm:$0x1] %v873_v17  ;;  %v894_v28 = vrot.slane %v893_v25, 2  ;;  %v850_v23 = vmul.f32 %v849_v12, %v759_v47 }
 0x1f3   :  { %v882_v3 = vrot.slane %v881_v38, 2 }
 0x1f4   :  { %v895_v15 = vadd.f32 %v894_v28, %v893_v25  ;;  %v852_v24 = vsel %vm851_vm14, %v759_v47, %v850_v23 }
 0x1f5   :  { %v883_v58 = vadd.f32 %v882_v3, %v881_v38  ;;  %v855_v27 = vsel %vm853_vm15, %v854_v37, %v852_v24 }
 0x1f6   :  { %v896_v31 = vrot.slane %v895_v15, 1  ;;  %v898_v0 = vrot.slane %v855_v27, 4 }
 0x1f7   :  { %v884_v62 = vrot.slane %v883_v58, 1 }
 0x1f8   :  { %v897_v48 = vadd.f32 %v896_v31, %v895_v15  ;;  %v899_v32 = vadd.f32 %v898_v0, %v855_v27 }
 0x1f9   :  { %v885_v4 = vadd.f32 %v884_v62, %v883_v58 }
 0x1fa   :  { %910 = vst [vmem:[#allocation2 + $0x6] sm:$0x1] %v897_v48  ;;  %v900_v33 = vrot.slane %v899_v32, 2 }
 0x1fb   :  { %908 = vst [vmem:[#allocation2 + $0x4] sm:$0x1] %v885_v4 }
 0x1fc   :  { %v901_v44 = vadd.f32 %v900_v33, %v899_v32 }
 0x1fe   :  { %v902_v29 = vrot.slane %v901_v44, 1 }
 0x200   :  { %v903_v34 = vadd.f32 %v902_v29, %v901_v44 }
 0x202   :  { %911 = vst [vmem:[#allocation2 + $0x7] sm:$0x1] %v903_v34 }
 0x203   :  { %924 = dma.vmem_to_hbm [thread:$0]  %s917_s17, 128, %s919_s20, [#allocation3], %s1020_s21, %s1020_s21, %s1021_s22  }
 0x204   :  { %1009 = dma.done.wait [#allocation3], 128  }
 0x205   :  { %1010 = vsyncadd [#allocation3], 4294967168 }
 0x206   :  { %929 = vsyncpa [#allocation3], 1 }

</bundles_post_ra>
